<compile_context>
chip_gen: v7x
topology: tpu7x:2x2x1
jax: 0.10.0
libtpu: 0.0.40
codegen_flags: <defaults>
</compile_context>

<pallas_src>
import jax
import jax.numpy as jnp
from jax.experimental import pallas as pl
from jax.experimental.pallas import tpu as pltpu

_LN_EPS = 1e-5                 # PyTorch nn.LayerNorm default eps
_SOFTPLUS_THRESHOLD = 20.0     # PyTorch F.softplus default threshold


def _round_up(n: int, m: int) -> int:
    return ((n + m - 1) // m) * m


def _choose_tiling(B: int, tile_b: int):
    """Pick (batch_tile, strip, n_strips).

    Small batches (< 256) run as a single full-extent grid step. Larger
    batches get lane-aligned tiles, capped at ~B/2 so the grid has >= 2 steps
    (v7x megacore sharding via dimension_semantics=("parallel",)).
    """
    if B < 256:
        return B, B, 1
    tile = _round_up(min(max(tile_b, 128), B), 128)
    half = _round_up((B + 1) // 2, 128)      # keep >= 2 grid steps
    tile = min(tile, half)
    for strip in (512, 256, 128):            # strip divides tile (tile % 128 == 0)
        if tile % strip == 0:
            return tile, strip, tile // strip
    return tile, tile, 1                     # unreachable


def _w_row_offsets(dims):
    offs, r = [], 0
    for d_out in dims[1:]:
        offs.append(r)
        r += _round_up(d_out, 8)
    return offs, r


def _pack_params(params, dims, matmul_dtype):
    """Pack parameters into two constant-index slabs (one-time tiny XLA ops).

    w_slab   : (sum round_up(d_out, 8), max(d_in)), dtype = matmul_dtype.
               Transposed weights (d_out, d_in) stacked along rows, zero padded.
    vec_slab : (max(d_out), 3*n_hidden + 1) f32.
               Columns per hidden layer: [bias, gamma, beta]; last column: output bias.
    """
    n_hidden = len(dims) - 2
    n_layers = n_hidden + 1
    d_ins, d_outs = dims[:-1], dims[1:]
    w_cols = max(d_ins)
    max_d = max(d_outs)

    w_blocks, v_cols = [], []
    idx = 0
    for li in range(n_layers):
        w, b = params[idx], params[idx + 1]
        idx += 2
        wt = w.T.astype(matmul_dtype)                       # (d_out, d_in)
        wt = jnp.pad(wt, ((0, _round_up(d_outs[li], 8) - d_outs[li]),
                          (0, w_cols - d_ins[li])))
        w_blocks.append(wt)
        v_cols.append(b.reshape(-1))
        if li < n_hidden:
            g, be = params[idx], params[idx + 1]
            idx += 2
            v_cols.append(g.reshape(-1))
            v_cols.append(be.reshape(-1))

    w_slab = jnp.concatenate(w_blocks, axis=0)
    vec_slab = jnp.stack(
        [jnp.pad(v.astype(jnp.float32), (0, max_d - v.shape[0])) for v in v_cols],
        axis=1)
    return w_slab, vec_slab


def _make_kernel(dims, row_offs, strip, n_strips, matmul_dtype):
    dims = tuple(int(d) for d in dims)
    n_hidden = len(dims) - 2
    d_ins, d_outs = dims[:-1], dims[1:]
    bf = matmul_dtype != jnp.float32

    def kernel(x_ref, w_ref, v_ref, o_ref):
        # x_ref : (tile, dim_u) batch-major     w_ref : packed weight slab
        # v_ref : packed bias/gamma/beta slab   o_ref : (n_out, tile) feature-major

        def w_slice(li):                                    # (d_out, d_in)
            r0 = row_offs[li]
            return w_ref[r0:r0 + d_outs[li], 0:d_ins[li]]

        def v_slice(col, d):                                # (d, 1) column vector
            return v_ref[0:d, col:col + 1]

        # Fully-unrolled strip loop with *static* lane offsets: bounds live
        # temporaries to ~(d, strip) (~16 vregs at strip=512) and keeps every
        # output store lane-dense and statically lowered.
        for s in range(n_strips):
            off = s * strip
            xs = x_ref[off:off + strip, :]                  # (strip, dim_u)
            if xs.dtype != matmul_dtype:
                xs = xs.astype(matmul_dtype)

            # First Linear: the batch-major -> feature-major transpose is
            # folded into the dot by contracting xs's feature axis.
            h = jax.lax.dot_general(
                w_slice(0), xs,
                dimension_numbers=(((1,), (1,)), ((), ())),
                preferred_element_type=jnp.float32)          # (d1, strip)

            for li in range(n_hidden):
                d = d_outs[li]
                h = h + v_slice(3 * li, d)                   # bias

                # LayerNorm over the feature axis (axis 0; lanes = batch).
                mu = jnp.mean(h, axis=0, keepdims=True)
                var = jnp.mean((h - mu) ** 2, axis=0, keepdims=True)
                h = ((h - mu) * jax.lax.rsqrt(var + _LN_EPS)
                     * v_slice(3 * li + 1, d) + v_slice(3 * li + 2, d))

                # Mish: x * tanh(softplus(x)), softplus threshold 20 (PyTorch).
                # Single-exp identity: tanh(log1p(e^x)) = t(t+2)/(t(t+2)+2).
                t = jnp.exp(jnp.minimum(h, _SOFTPLUS_THRESHOLD))
                num = t * (t + 2.0)
                den = num + 2.0
                r = pl.reciprocal(den, approx=True)          # EUP slot (cheap)
                r = r * (2.0 - den * r)                      # Newton -> ~fp32 exact
                h = jnp.where(h > _SOFTPLUS_THRESHOLD, h, h * num * r)

                # Dropout(hid_drop): eval-mode forward -> identity.

                hm = h.astype(matmul_dtype) if bf else h
                h = jnp.dot(w_slice(li + 1), hm,
                            preferred_element_type=jnp.float32)

            y = h + v_slice(3 * n_hidden, d_outs[-1])        # output-layer bias
            o_ref[:, off:off + strip] = y.astype(o_ref.dtype)  # lane-dense store

    return kernel


def s_decoder_forward(x, params, dims, *, tile_b: int = 2048,
                      matmul_dtype=jnp.float32, return_batch_major: bool = True):
    """S_Decoder forward: x (B, dim_u) -> (B, n_batches).

    params            : flat list from `init_s_decoder_params`.
    dims              : [dim_u, *dims_dec_s, n_batches].
    tile_b            : batch rows per grid step (default 2048; capped at ~B/2).
    matmul_dtype      : jnp.float32 (default, module-faithful) or jnp.bfloat16
                        for single-pass MXU operands (f32 accumulation).
    return_batch_major: if False, return (n_batches, B) and skip the wrapper
                        transpose entirely.
    """
    dims = [int(d) for d in dims]
    B, dim_u = x.shape
    assert dim_u == dims[0]
    n_out = dims[-1]

    tile, strip, n_strips = _choose_tiling(B, tile_b)
    grid = pl.cdiv(B, tile)

    # Packed once per call; hoist out of the hot path / jit in production.
    w_slab, vec_slab = _pack_params(params, dims, matmul_dtype)
    row_offs, _ = _w_row_offsets(dims)

    kernel = _make_kernel(dims, row_offs, strip, n_strips, matmul_dtype)

    fn = pl.pallas_call(
        kernel,
        out_shape=jax.ShapeDtypeStruct((n_out, B), x.dtype),
        grid_spec=pltpu.PrefetchScalarGridSpec(
            num_scalar_prefetch=0,
            grid=(grid,),
            in_specs=[
                pl.BlockSpec((tile, dim_u), lambda i: (i, 0)),      # x (batch-major)
                pl.BlockSpec(w_slab.shape, lambda i: (0, 0)),       # weight slab
                pl.BlockSpec(vec_slab.shape, lambda i: (0, 0)),     # vec slab
            ],
            out_specs=pl.BlockSpec((n_out, tile), lambda i: (0, i)),
        ),
        compiler_params=pltpu.CompilerParams(dimension_semantics=("parallel",)),
    )
    y_t = fn(x, w_slab, vec_slab)          # (n_out, B), lane-dense kernel stores
    if return_batch_major:
        return y_t.T                        # (B, n_out) — module layout
    return y_t


def init_s_decoder_params(key, dims):
    """Deterministic parameter init mirroring the module's layer shapes.

    Flat list:
      hidden layer i: W_i (d_in, d_out), b_i (1, d_out), gamma_i (1, d_out), beta_i (1, d_out)
      output layer  : W_out, b_out
    """
    params = []
    n_layers = len(dims) - 1
    keys = jax.random.split(key, 2 * n_layers)
    for i in range(n_layers):
        d_in, d_out = dims[i], dims[i + 1]
        bound = 1.0 / jnp.sqrt(d_in)
        w = jax.random.uniform(keys[2 * i], (d_in, d_out), jnp.float32, -bound, bound)
        b = jax.random.uniform(keys[2 * i + 1], (1, d_out), jnp.float32, -bound, bound)
        params.extend([w, b])
        if i < n_layers - 1:  # hidden layer -> LayerNorm affine params
            params.append(jnp.ones((1, d_out), jnp.float32))   # gamma
            params.append(jnp.zeros((1, d_out), jnp.float32))  # beta
    return params


def s_decoder_reference(x, params, dims):
    """Pure-JAX reference (module semantics, batch-major) for correctness."""
    n_hidden = len(dims) - 2
    h = x.astype(jnp.float32)
    idx = 0
    for _ in range(n_hidden):
        w, b, g, be = params[idx], params[idx + 1], params[idx + 2], params[idx + 3]
        idx += 4
        h = h @ w + b
        mu = jnp.mean(h, axis=-1, keepdims=True)
        var = jnp.mean((h - mu) ** 2, axis=-1, keepdims=True)
        h = (h - mu) / jnp.sqrt(var + _LN_EPS) * g + be
        sp = jnp.where(h > 20.0, h, jnp.log1p(jnp.exp(jnp.minimum(h, 20.0))))
        h = h * jnp.tanh(sp)
    return h @ params[idx] + params[idx + 1]


if __name__ == "__main__":
    # Shapes consistent with S_Decoder(n_batches=8, dims_dec_s=[32, 32],
    # dim_u=8, norm='ln', drop=0.2).
    dim_u = 8
    dims_dec_s = [32, 32]
    n_batches = 8
    dims = [dim_u] + dims_dec_s + [n_batches]

    key = jax.random.PRNGKey(0)
    k_p, k_x1, k_x2, k_x3 = jax.random.split(key, 4)
    params = init_s_decoder_params(k_p, dims)

    # 1) Small batch: single full-extent grid step.
    x1 = jax.random.normal(k_x1, (16, dim_u), dtype=jnp.float32)
    out1 = jax.block_until_ready(s_decoder_forward(x1, params, dims))
    ref1 = s_decoder_reference(x1, params, dims)
    assert out1.shape == (16, n_batches)
    assert jnp.allclose(out1, ref1, atol=3e-4, rtol=3e-4), "mismatch (B=16)"

    # 2) Ragged batch: 2 grid steps ("parallel" -> megacore-shardable on v7x),
    #    partial last block handled by Pallas (no wrapper padding pass).
    x2 = jax.random.normal(k_x2, (300, dim_u), dtype=jnp.float32)
    out2 = jax.block_until_ready(s_decoder_forward(x2, params, dims))
    ref2 = s_decoder_reference(x2, params, dims)
    assert out2.shape == (300, n_batches)
    assert jnp.allclose(out2, ref2, atol=3e-4, rtol=3e-4), "mismatch (B=300)"

    # 3) Larger batch exercising the unrolled 512-lane strip loop (tile=1024, 2 strips).
    x3 = jax.random.normal(k_x3, (2048, dim_u), dtype=jnp.float32)
    out3 = jax.block_until_ready(s_decoder_forward(x3, params, dims))
    ref3 = s_decoder_reference(x3, params, dims)
    assert out3.shape == (2048, n_batches)
    assert jnp.allclose(out3, ref3, atol=3e-4, rtol=3e-4), "mismatch (B=2048)"

    # 4) bf16 MXU-operand variant (single-pass MXU, f32 accumulation/LN/Mish).
    out4 = jax.block_until_ready(
        s_decoder_forward(x2, params, dims, matmul_dtype=jnp.bfloat16))
    assert jnp.allclose(out4, ref2, atol=3e-2, rtol=3e-2), "mismatch (bf16 matmul)"

    print("KERNEL_OK")
</pallas_src>

<mosaic_0001>
module attributes {stable_mosaic.version = 11 : i64} {
  func.func @kernel(%arg0: i32, %arg1: memref<16x8xf32, #tpu.memory_space<vmem>>, %arg2: memref<72x32xf32, #tpu.memory_space<vmem>>, %arg3: memref<32x7xf32, #tpu.memory_space<vmem>>, %arg4: memref<8x16xf32, #tpu.memory_space<vmem>>) attributes {dimension_semantics = [#tpu.dimension_semantics<parallel>], iteration_bounds = array<i64: 1>, scalar_prefetch = 0 : i64, scratch_operands = 0 : i64, tpu.core_type = #tpu.core_type<tc>, window_params = [{transform_indices = @transform_0, window_bounds = array<i64: 16, 8>}, {pipeline_mode = #tpu.pipeline_mode<synchronous>, transform_indices = @transform_1, window_bounds = array<i64: 72, 32>}, {pipeline_mode = #tpu.pipeline_mode<synchronous>, transform_indices = @transform_2, window_bounds = array<i64: 32, 7>}, {transform_indices = @transform_3, window_bounds = array<i64: 8, 16>}]} {
    %c0 = arith.constant 0 : index
    %c0_0 = arith.constant 0 : index
    %0 = vector.load %arg1[%c0, %c0_0] : memref<16x8xf32, #tpu.memory_space<vmem>>, vector<16x8xf32>
    %c0_1 = arith.constant 0 : index
    %c0_2 = arith.constant 0 : index
    %1 = vector.load %arg2[%c0_1, %c0_2] : memref<72x32xf32, #tpu.memory_space<vmem>>, vector<32x8xf32>
    %cst = arith.constant dense<0.000000e+00> : vector<32x16xf32>
    %2 = tpu.matmul %1, %0, %cst {dimension_numbers = #tpu.dot_dimension_numbers<[1], [1], [0], [0], [0, 0, 1, 0], [], []>} : vector<32x8xf32>, vector<16x8xf32>, vector<32x16xf32> -> vector<32x16xf32>
    %c0_3 = arith.constant 0 : index
    %c0_4 = arith.constant 0 : index
    %3 = vector.load %arg3[%c0_3, %c0_4] : memref<32x7xf32, #tpu.memory_space<vmem>>, vector<32x1xf32>
    %4 = vector.broadcast %3 : vector<32x1xf32> to vector<32x16xf32>
    %5 = arith.addf %2, %4 : vector<32x16xf32>
    %cst_5 = arith.constant dense<0.000000e+00> : vector<16xf32>
    %6 = vector.multi_reduction <add>, %5, %cst_5 [0] : vector<32x16xf32> to vector<16xf32>
    %7 = vector.shape_cast %6 : vector<16xf32> to vector<1x16xf32>
    %cst_6 = arith.constant 3.200000e+01 : f32
    %8 = vector.broadcast %cst_6 : f32 to vector<1x16xf32>
    %9 = arith.divf %7, %8 : vector<1x16xf32>
    %10 = vector.broadcast %9 : vector<1x16xf32> to vector<32x16xf32>
    %11 = arith.subf %5, %10 : vector<32x16xf32>
    %12 = arith.mulf %11, %11 : vector<32x16xf32>
    %cst_7 = arith.constant dense<0.000000e+00> : vector<16xf32>
    %13 = vector.multi_reduction <add>, %12, %cst_7 [0] : vector<32x16xf32> to vector<16xf32>
    %14 = vector.shape_cast %13 : vector<16xf32> to vector<1x16xf32>
    %cst_8 = arith.constant 3.200000e+01 : f32
    %15 = vector.broadcast %cst_8 : f32 to vector<1x16xf32>
    %16 = arith.divf %14, %15 : vector<1x16xf32>
    %17 = vector.broadcast %9 : vector<1x16xf32> to vector<32x16xf32>
    %18 = arith.subf %5, %17 : vector<32x16xf32>
    %cst_9 = arith.constant 9.99999974E-6 : f32
    %19 = vector.broadcast %cst_9 : f32 to vector<1x16xf32>
    %20 = arith.addf %16, %19 : vector<1x16xf32>
    %21 = math.rsqrt %20 : vector<1x16xf32>
    %22 = vector.broadcast %21 : vector<1x16xf32> to vector<32x16xf32>
    %23 = arith.mulf %18, %22 : vector<32x16xf32>
    %c0_10 = arith.constant 0 : index
    %c1 = arith.constant 1 : index
    %24 = vector.load %arg3[%c0_10, %c1] : memref<32x7xf32, #tpu.memory_space<vmem>>, vector<32x1xf32>
    %25 = vector.broadcast %24 : vector<32x1xf32> to vector<32x16xf32>
    %26 = arith.mulf %23, %25 : vector<32x16xf32>
    %c0_11 = arith.constant 0 : index
    %c2 = arith.constant 2 : index
    %27 = vector.load %arg3[%c0_11, %c2] : memref<32x7xf32, #tpu.memory_space<vmem>>, vector<32x1xf32>
    %28 = vector.broadcast %27 : vector<32x1xf32> to vector<32x16xf32>
    %29 = arith.addf %26, %28 : vector<32x16xf32>
    %cst_12 = arith.constant 2.000000e+01 : f32
    %30 = vector.broadcast %cst_12 : f32 to vector<32x16xf32>
    %31 = arith.minimumf %29, %30 : vector<32x16xf32>
    %32 = math.exp %31 : vector<32x16xf32>
    %cst_13 = arith.constant 2.000000e+00 : f32
    %33 = vector.broadcast %cst_13 : f32 to vector<32x16xf32>
    %34 = arith.addf %32, %33 : vector<32x16xf32>
    %35 = arith.mulf %32, %34 : vector<32x16xf32>
    %cst_14 = arith.constant 2.000000e+00 : f32
    %36 = vector.broadcast %cst_14 : f32 to vector<32x16xf32>
    %37 = arith.addf %35, %36 : vector<32x16xf32>
    %38 = tpu.reciprocal %37 {approx = true} : vector<32x16xf32> -> vector<32x16xf32>
    %39 = arith.mulf %37, %38 : vector<32x16xf32>
    %cst_15 = arith.constant 2.000000e+00 : f32
    %40 = vector.broadcast %cst_15 : f32 to vector<32x16xf32>
    %41 = arith.subf %40, %39 : vector<32x16xf32>
    %42 = arith.mulf %38, %41 : vector<32x16xf32>
    %cst_16 = arith.constant 2.000000e+01 : f32
    %43 = vector.broadcast %cst_16 : f32 to vector<32x16xf32>
    %44 = arith.cmpf ogt, %29, %43 : vector<32x16xf32>
    %45 = arith.mulf %29, %35 : vector<32x16xf32>
    %46 = arith.mulf %45, %42 : vector<32x16xf32>
    %47 = arith.select %44, %29, %46 : vector<32x16xi1>, vector<32x16xf32>
    %c32 = arith.constant 32 : index
    %c0_17 = arith.constant 0 : index
    %48 = vector.load %arg2[%c32, %c0_17] : memref<72x32xf32, #tpu.memory_space<vmem>>, vector<32x32xf32>
    %cst_18 = arith.constant dense<0.000000e+00> : vector<32x16xf32>
    %49 = tpu.matmul %48, %47, %cst_18 {dimension_numbers = #tpu.dot_dimension_numbers<[1], [0], [0], [1], [0, 0, 1, 1], [], []>} : vector<32x32xf32>, vector<32x16xf32>, vector<32x16xf32> -> vector<32x16xf32>
    %c0_19 = arith.constant 0 : index
    %c3 = arith.constant 3 : index
    %50 = vector.load %arg3[%c0_19, %c3] : memref<32x7xf32, #tpu.memory_space<vmem>>, vector<32x1xf32>
    %51 = vector.broadcast %50 : vector<32x1xf32> to vector<32x16xf32>
    %52 = arith.addf %49, %51 : vector<32x16xf32>
    %cst_20 = arith.constant dense<0.000000e+00> : vector<16xf32>
    %53 = vector.multi_reduction <add>, %52, %cst_20 [0] : vector<32x16xf32> to vector<16xf32>
    %54 = vector.shape_cast %53 : vector<16xf32> to vector<1x16xf32>
    %cst_21 = arith.constant 3.200000e+01 : f32
    %55 = vector.broadcast %cst_21 : f32 to vector<1x16xf32>
    %56 = arith.divf %54, %55 : vector<1x16xf32>
    %57 = vector.broadcast %56 : vector<1x16xf32> to vector<32x16xf32>
    %58 = arith.subf %52, %57 : vector<32x16xf32>
    %59 = arith.mulf %58, %58 : vector<32x16xf32>
    %cst_22 = arith.constant dense<0.000000e+00> : vector<16xf32>
    %60 = vector.multi_reduction <add>, %59, %cst_22 [0] : vector<32x16xf32> to vector<16xf32>
    %61 = vector.shape_cast %60 : vector<16xf32> to vector<1x16xf32>
    %cst_23 = arith.constant 3.200000e+01 : f32
    %62 = vector.broadcast %cst_23 : f32 to vector<1x16xf32>
    %63 = arith.divf %61, %62 : vector<1x16xf32>
    %64 = vector.broadcast %56 : vector<1x16xf32> to vector<32x16xf32>
    %65 = arith.subf %52, %64 : vector<32x16xf32>
    %cst_24 = arith.constant 9.99999974E-6 : f32
    %66 = vector.broadcast %cst_24 : f32 to vector<1x16xf32>
    %67 = arith.addf %63, %66 : vector<1x16xf32>
    %68 = math.rsqrt %67 : vector<1x16xf32>
    %69 = vector.broadcast %68 : vector<1x16xf32> to vector<32x16xf32>
    %70 = arith.mulf %65, %69 : vector<32x16xf32>
    %c0_25 = arith.constant 0 : index
    %c4 = arith.constant 4 : index
    %71 = vector.load %arg3[%c0_25, %c4] : memref<32x7xf32, #tpu.memory_space<vmem>>, vector<32x1xf32>
    %72 = vector.broadcast %71 : vector<32x1xf32> to vector<32x16xf32>
    %73 = arith.mulf %70, %72 : vector<32x16xf32>
    %c0_26 = arith.constant 0 : index
    %c5 = arith.constant 5 : index
    %74 = vector.load %arg3[%c0_26, %c5] : memref<32x7xf32, #tpu.memory_space<vmem>>, vector<32x1xf32>
    %75 = vector.broadcast %74 : vector<32x1xf32> to vector<32x16xf32>
    %76 = arith.addf %73, %75 : vector<32x16xf32>
    %cst_27 = arith.constant 2.000000e+01 : f32
    %77 = vector.broadcast %cst_27 : f32 to vector<32x16xf32>
    %78 = arith.minimumf %76, %77 : vector<32x16xf32>
    %79 = math.exp %78 : vector<32x16xf32>
    %cst_28 = arith.constant 2.000000e+00 : f32
    %80 = vector.broadcast %cst_28 : f32 to vector<32x16xf32>
    %81 = arith.addf %79, %80 : vector<32x16xf32>
    %82 = arith.mulf %79, %81 : vector<32x16xf32>
    %cst_29 = arith.constant 2.000000e+00 : f32
    %83 = vector.broadcast %cst_29 : f32 to vector<32x16xf32>
    %84 = arith.addf %82, %83 : vector<32x16xf32>
    %85 = tpu.reciprocal %84 {approx = true} : vector<32x16xf32> -> vector<32x16xf32>
    %86 = arith.mulf %84, %85 : vector<32x16xf32>
    %cst_30 = arith.constant 2.000000e+00 : f32
    %87 = vector.broadcast %cst_30 : f32 to vector<32x16xf32>
    %88 = arith.subf %87, %86 : vector<32x16xf32>
    %89 = arith.mulf %85, %88 : vector<32x16xf32>
    %cst_31 = arith.constant 2.000000e+01 : f32
    %90 = vector.broadcast %cst_31 : f32 to vector<32x16xf32>
    %91 = arith.cmpf ogt, %76, %90 : vector<32x16xf32>
    %92 = arith.mulf %76, %82 : vector<32x16xf32>
    %93 = arith.mulf %92, %89 : vector<32x16xf32>
    %94 = arith.select %91, %76, %93 : vector<32x16xi1>, vector<32x16xf32>
    %c64 = arith.constant 64 : index
    %c0_32 = arith.constant 0 : index
    %95 = vector.load %arg2[%c64, %c0_32] : memref<72x32xf32, #tpu.memory_space<vmem>>, vector<8x32xf32>
    %cst_33 = arith.constant dense<0.000000e+00> : vector<8x16xf32>
    %96 = tpu.matmul %95, %94, %cst_33 {dimension_numbers = #tpu.dot_dimension_numbers<[1], [0], [0], [1], [0, 0, 1, 1], [], []>} : vector<8x32xf32>, vector<32x16xf32>, vector<8x16xf32> -> vector<8x16xf32>
    %c0_34 = arith.constant 0 : index
    %c6 = arith.constant 6 : index
    %97 = vector.load %arg3[%c0_34, %c6] : memref<32x7xf32, #tpu.memory_space<vmem>>, vector<8x1xf32>
    %98 = vector.broadcast %97 : vector<8x1xf32> to vector<8x16xf32>
    %99 = arith.addf %96, %98 : vector<8x16xf32>
    %c0_35 = arith.constant 0 : index
    %c0_36 = arith.constant 0 : index
    %100 = vector.load %arg4[%c0_35, %c0_36] : memref<8x16xf32, #tpu.memory_space<vmem>>, vector<8x16xf32>
    tpu.vector_store %arg4[%c0_35, %c0_36], %99 {strides = array<i32>} : memref<8x16xf32, #tpu.memory_space<vmem>>, vector<8x16xf32>,
    return
  }
  func.func @transform_0(%arg0: i32) -> (i32, i32) {
    %c0_i32 = arith.constant 0 : i32
    %c0_i32_0 = arith.constant 0 : i32
    return %arg0, %c0_i32 : i32, i32
  }
  func.func @transform_1(%arg0: i32) -> (i32, i32) {
    %c0_i32 = arith.constant 0 : i32
    %c0_i32_0 = arith.constant 0 : i32
    %c0_i32_1 = arith.constant 0 : i32
    return %c0_i32, %c0_i32_0 : i32, i32
  }
  func.func @transform_2(%arg0: i32) -> (i32, i32) {
    %c0_i32 = arith.constant 0 : i32
    %c0_i32_0 = arith.constant 0 : i32
    %c0_i32_1 = arith.constant 0 : i32
    return %c0_i32, %c0_i32_0 : i32, i32
  }
  func.func @transform_3(%arg0: i32) -> (i32, i32) {
    %c0_i32 = arith.constant 0 : i32
    %c0_i32_0 = arith.constant 0 : i32
    return %c0_i32, %arg0 : i32, i32
  }
}

</mosaic_0001>

<bundles_post_ra>
// kernel: tpu_custom_call.1
= control target key start
LH: loop header
LB: loop body
LE: loop exit
PB: predicated region body
PF: predicated region fallthrough
CT: control target
= control target key end

     0   :  { %vm45_vm0 = vcmask 64512   ;;  %v814_v4 = vmov 0   ;;  %s995_s0 = inlined_call_operand.vmem [shape: f32[16,8], index: 0, kind: input, shape index: {}]   ;;  %s996_s1 = inlined_call_operand.vmem [shape: f32[72,32], index: 1, kind: input, shape index: {}]   ;;  %s997_s2 = inlined_call_operand.vmem [shape: f32[32,7], index: 2, kind: input, shape index: {}]   ;;  %s998_s3 = inlined_call_operand.hbm [shape: f32[8,16], index: 3, kind: output, shape index: {}]  }
   0x1   :  { %v15_v0 = vld [vmem:[%s995_s0] sm:$0xff]  ;;  %v16_v1 = vld [vmem:[%s995_s0 + $0x8] sm:$0xff]  ;;  %vm706_vm1 = vmpackc.low %vm45_vm0, %vm45_vm0  ;;  %736 = vset.pattern.permute.xlu0 %v814_v4  ;;  %737 = vset.pattern.permute.xlu1 %v814_v4 }
   0x2   :  { %v17_v2 = vld [vmem:[%s996_s1] sm:$0xff]  ;;  %v705_v3 = vpack.c.bf16 %v16_v1, %v15_v0  ;;  %v865_v6 = vld [vmem:[%s997_s2 + $0x10] sm:$0xff] }
   0x3   :  { %674 = vmatprep.mubr.msk.f32.mxu0 %vm45_vm0, %v17_v2  ;;  %v860_v5 = vld [vmem:[%s997_s2] sm:$0xff] }
   0x4   :  { %707 = vmatprep.subr.msk.bf16.mxu0 %vm706_vm1, %v705_v3  ;;  %27 = vperm.xlu0 %736, %v860_v5  }
   0x5   :  { %8 = vsyncpa [#allocation3], 0  ;;  %710 = vmatpush3.bf16.xpose.msk.msra.mxu0 %vm706_vm1, %v705_v3  ;;  %37 = vperm.xlu1 %737, %v865_v6   ;;  %v872_v7 = vld [vmem:[%s997_s2 + $0x8] sm:$0xff]  ;;  %v877_v8 = vld [vmem:[%s997_s2 + $0x18] sm:$0xff]  ;;  %v815_v11 = vmov 1   ;;  %v816_v13 = vmov 2  }
   0x6   :  { %v18_v9 = vld [vmem:[%s996_s1 + $0x8] sm:$0xff]  ;;  %v19_v10 = vld [vmem:[%s996_s1 + $0x10] sm:$0xff]  ;;  %v20_v12 = vld [vmem:[%s996_s1 + $0x18] sm:$0xff]  ;;  %vm309_vm2 = vcmask 261120   ;;  %vm149_vm3 = vcmask 130048   ;;  %v817_v19 = vmov 3  }
   0x7   :  { %v289_v15 = vld [vmem:[%s996_s1 + $0x20] sm:$0xff]  ;;  %v818_v33 = vmov 4   ;;  %v819_v37 = vmov 5   ;;  %vm821_vm8 = vmmov 0   ;;  %s824_s13 = smov [#allocation2]  }
   0x8   :  { %32 = vperm.xlu0 %736, %v872_v7   ;;  %688 = vmatprep.mubr.msk.f32.mxu1 %vm309_vm2, %v289_v15  ;;  %s632_s14 = sshll.u32 %s824_s13, 4  ;;  %s633_s14 = int_to_ptr.vmem [resolvable:$true] %s632_s14 }
   0x9   :  { %42 = vperm.xlu1 %737, %v877_v8   ;;  %s790_s15 = scalar_lea.vmem %s633_s14, 128  ;;  %p795_p1 = scmp.lt.s32.totalorder %s633_s14, %s633_s14 }
   0xa   :  { %p791_p0 = scmp.ne.s32.totalorder %s633_s14, %s790_s15  ;;  %p796_p2 = scmp.lt.s32.totalorder %s790_s15, %s790_s15 }
   0xc   :  { %675 = vmatmul.mubr.msk.f32.vlgmr.msra.gmra.mrb[0].mxu0 %vm45_vm0, %v18_v9  ;;  %738 = vset.pattern.permute.xlu0 %v815_v11  ;;  %p797_p3 = por %p796_p2, %p795_p1 }
   0xd   :  { %677 = vmatprep.mubr.msk.f32.mxu0 %vm45_vm0, %v19_v10  ;;  %739 = vset.pattern.permute.xlu1 %v815_v11 }
   0xe   :  { %198 = vperm.xlu1 %739, %v872_v7   ;;  %194 = vperm.xlu0 %738, %v860_v5   ;;  %p798_p4 = pnand %p797_p3, %p791_p0 }
  0x10   :  { %678 = vmatmul.mubr.msk.f32.gmra.mrb[2].mxu0 %vm45_vm0, %v20_v12 }
  0x12   :  { %740 = vset.pattern.permute.xlu1 %v816_v13  ;;  %741 = vset.pattern.permute.xlu0 %v816_v13 }
  0x13   :  { %214 = vperm.xlu1 %740, %v860_v5   ;;  %218 = vperm.xlu0 %741, %v872_v7  }
  0x17   :  { %742 = vset.pattern.permute.xlu1 %v815_v11  ;;  %222 = vperm.xlu0 %741, %v865_v6  }
  0x18   :  { %202 = vperm.xlu1 %742, %v865_v6  }
  0x1b   :  { %744 = vset.pattern.permute.xlu0 %v817_v19 }
  0x1c   :  { %206 = vperm.xlu1 %742, %v877_v8   ;;  %294 = vperm.xlu0 %744, %v860_v5  }
  0x20   :  { %743 = vset.pattern.permute.xlu1 %v816_v13  ;;  %306 = vperm.xlu0 %744, %v877_v8  }
  0x21   :  { %226 = vperm.xlu1 %743, %v877_v8  }
  0x24   :  { %747 = vset.pattern.permute.xlu0 %v818_v33 }
  0x25   :  { %745 = vset.pattern.permute.xlu1 %v817_v19  ;;  %454 = vperm.xlu0 %747, %v872_v7  }
  0x26   :  { %298 = vperm.xlu1 %745, %v872_v7  }
  0x29   :  { %458 = vperm.xlu0 %747, %v865_v6  }
  0x2a   :  { %302 = vperm.xlu1 %745, %v865_v6  }
  0x2d   :  { %750 = vset.pattern.permute.xlu0 %v819_v37 }
  0x2e   :  { %746 = vset.pattern.permute.xlu1 %v818_v33  ;;  %478 = vperm.xlu0 %750, %v865_v6  }
  0x2f   :  { %450 = vperm.xlu1 %746, %v860_v5  }
  0x33   :  { %748 = vset.pattern.permute.xlu1 %v819_v37 }
  0x34   :  { %470 = vperm.xlu1 %748, %v860_v5  }
  0x38   :  { %474 = vperm.xlu1 %748, %v872_v7  }
  0x3c   :  { %749 = vset.pattern.permute.xlu1 %v818_v33 }
  0x3d   :  { %462 = vperm.xlu1 %749, %v877_v8  }
  0x41   :  { %751 = vset.pattern.permute.xlu1 %v819_v37 }
  0x42   :  { %482 = vperm.xlu1 %751, %v877_v8  }
  0x83   :  { %v28_v14 = vpop.permute.xlu0 %27 }
  0x84   :  { %v38_v16 = vpop.permute.xlu1 %37 }
  0x87   :  { %v33_v17 = vpop.permute.xlu0 %32 }
  0x88   :  { %v43_v24 = vpop.permute.xlu1 %42 }
  0x8d   :  { %v199_v61 = vpop.permute.xlu1 %198  ;;  %v195_v7 = vpop.permute.xlu0 %194 }
  0x92   :  { %v215_v2 = vpop.permute.xlu1 %214  ;;  %v219_v9 = vpop.permute.xlu0 %218 }
  0x97   :  { %v203_v6 = vpop.permute.xlu1 %202 }
  0x9b   :  { %v207_v8 = vpop.permute.xlu1 %206 }
  0xa0   :  { %v227_v15 = vpop.permute.xlu1 %226 }
  0xdf   :  { %v676_v18 = vpop.f32.mrb[0].mxu0 }
  0xe0   :  { %v136_v20 = vadd.f32 %v676_v18, %v33_v17  ;;  %v130_v21 = vpop.f32.mrb[1].mxu0 }
  0xe1   :  { %v131_v22 = vadd.f32 %v130_v21, %v28_v14 }
  0xe2   :  { %v151_v23 = vsel %vm149_vm3, %v136_v20, 0.0 }
  0xe3   :  { %v150_v25 = vsel %vm149_vm3, %v131_v22, 0.0  ;;  %v679_v26 = vpop.f32.mrb[2].mxu0 }
  0xe4   :  { %v152_v27 = vadd.f32 %v151_v23, %v150_v25  ;;  %v140_v28 = vpop.f32.mrb[3].mxu0  ;;  %v146_v29 = vadd.f32 %v679_v26, %v43_v24 }
  0xe5   :  { %v141_v30 = vadd.f32 %v140_v28, %v38_v16  ;;  %v223_v16 = vpop.permute.xlu0 %222 }
  0xe6   :  { %v155_v34 = vsel %vm149_vm3, %v146_v29, 0.0 }
  0xe7   :  { %v153_v31 = vsel %vm149_vm3, %v141_v30, 0.0 }
  0xe8   :  { %v154_v32 = vadd.f32 %v153_v31, %v152_v27 }
  0xea   :  { %v156_v35 = vadd.f32 %v155_v34, %v154_v32 }
  0xec   :  { %v157_v36 = vrot.slane %v156_v35, 4 }
  0xee   :  { %v158_v38 = vadd.f32 %v157_v36, %v156_v35 }
  0xf0   :  { %v159_v39 = vrot.slane %v158_v38, 2 }
  0xf2   :  { %v160_v40 = vadd.f32 %v159_v39, %v158_v38 }
  0xf4   :  { %v161_v41 = vrot.slane %v160_v40, 1 }
  0xf6   :  { %v162_v42 = vadd.f32 %v161_v41, %v160_v40 }
  0xf8   :  { %v164_v43 = vmul.f32 0.03125, %v162_v42 }
  0xfa   :  { %v167_v44 = vsub.f32 %v141_v30, %v164_v43  ;;  %v168_v45 = vsub.f32 %v146_v29, %v164_v43  ;;  %v165_v46 = vsub.f32 %v131_v22, %v164_v43  ;;  %v166_v47 = vsub.f32 %v136_v20, %v164_v43 }
  0xfc   :  { %v171_v48 = vmul.f32 %v167_v44, %v167_v44  ;;  %v169_v49 = vmul.f32 %v165_v46, %v165_v46  ;;  %v170_v50 = vmul.f32 %v166_v47, %v166_v47  ;;  %v172_v51 = vmul.f32 %v168_v45, %v168_v45 }
  0xfe   :  { %v173_v52 = vsel %vm149_vm3, %v169_v49, 0.0  ;;  %v174_v53 = vsel %vm149_vm3, %v170_v50, 0.0  ;;  %v176_v55 = vsel %vm149_vm3, %v171_v48, 0.0  ;;  %v178_v57 = vsel %vm149_vm3, %v172_v51, 0.0 }
  0xff   :  { %v175_v54 = vadd.f32 %v174_v53, %v173_v52 }
 0x101   :  { %v177_v56 = vadd.f32 %v176_v55, %v175_v54 }
 0x103   :  { %v179_v58 = vadd.f32 %v178_v57, %v177_v56 }
 0x105   :  { %v180_v59 = vrot.slane %v179_v58, 4 }
 0x107   :  { %v181_v60 = vadd.f32 %v180_v59, %v179_v58 }
 0x109   :  { %v182_v62 = vrot.slane %v181_v60, 2 }
 0x10b   :  { %v183_v63 = vadd.f32 %v182_v62, %v181_v60 }
 0x10d   :  { %v184_v0 = vrot.slane %v183_v63, 1 }
 0x10f   :  { %v185_v1 = vadd.f32 %v184_v0, %v183_v63 }
 0x111   :  { %v186_v3 = vmul.f32 0.03125, %v185_v1 }
 0x113   :  { %v187_v4 = vadd.f32 1e-05, %v186_v3 }
 0x115   :  { %754 = vrsqrt.f32 %v187_v4 }
 0x11f   :  { %v755_v10 = vpop.eup %754 }
 0x120   :  { %v190_v11 = vmul.f32 %v755_v10, %v166_v47  ;;  %v191_v12 = vmul.f32 %v755_v10, %v167_v44  ;;  %v189_v13 = vmul.f32 %v755_v10, %v165_v46  ;;  %v192_v14 = vmul.f32 %v755_v10, %v168_v45 }
 0x122   :  { %v210_v17 = vmul.f32 %v199_v61, %v190_v11  ;;  %v211_v18 = vmul.f32 %v203_v6, %v191_v12  ;;  %v209_v19 = vmul.f32 %v195_v7, %v189_v13  ;;  %v212_v20 = vmul.f32 %v207_v8, %v192_v14 }
 0x124   :  { %v229_v21 = vadd.f32 %v215_v2, %v209_v19  ;;  %v230_v22 = vadd.f32 %v219_v9, %v210_v17  ;;  %v925_v23 = vadd.f32 %v227_v15, %v212_v20  ;;  %v927_v24 = vadd.f32 %v223_v16, %v211_v18  ;;  %v290_v16 = vld [vmem:[%s996_s1 + $0x28] sm:$0xff]  ;;  %v291_v17 = vld [vmem:[%s996_s1 + $0x30] sm:$0xff]  ;;  %v292_v18 = vld [vmem:[%s996_s1 + $0x38] sm:$0xff] }
 0x125   :  { %v820_v19 = vmov 0.0|0.0   ;;  %v822_v20 = vmov 0.0  }
 0x126   :  { %v233_v25 = vmin.f32 %v229_v21, 20.0  ;;  %v234_v26 = vmin.f32 %v230_v22, 20.0  ;;  %v236_v27 = vmin.f32 %v925_v23, 20.0  ;;  %v235_v28 = vmin.f32 %v927_v24, 20.0  ;;  %719 = vmatprep.subr.bf16.mxu0 %v820_v19  ;;  %702 = vmatprep.mubr.msk.f32.mxu0 %vm821_vm8, %v822_v20 }
 0x127   :  { %vm273_vm4 = vcmp.gt.f32.partialorder %v229_v21, 20.0  ;;  %vm274_vm5 = vcmp.gt.f32.partialorder %v230_v22, 20.0  ;;  %vm276_vm6 = vcmp.gt.f32.partialorder %v925_v23, 20.0  ;;  %vm275_vm7 = vcmp.gt.f32.partialorder %v927_v24, 20.0 }
 0x128   :  { %v237_v29 = vmul.f32 1.442695, %v233_v25  ;;  %v239_v30 = vmul.f32 1.442695, %v234_v26  ;;  %v243_v31 = vmul.f32 1.442695, %v236_v27 }
 0x129   :  { %v241_v32 = vmul.f32 1.442695, %v235_v28 }
 0x12a   :  { %756 = vpow2.f32 %v237_v29 }
 0x12b   :  { %758 = vpow2.f32 %v239_v30 }
 0x12c   :  { %760 = vpow2.f32 %v243_v31 }
 0x12d   :  { %762 = vpow2.f32 %v241_v32 }
 0x134   :  { %v757_v33 = vpop.eup %756 }
 0x135   :  { %v759_v34 = vpop.eup %758  ;;  %v245_v35 = vadd.f32 2.0, %v757_v33 }
 0x136   :  { %v761_v36 = vpop.eup %760  ;;  %v246_v37 = vadd.f32 2.0, %v759_v34 }
 0x137   :  { %v763_v38 = vpop.eup %762  ;;  %v248_v39 = vadd.f32 2.0, %v761_v36  ;;  %v249_v40 = vmul.f32 %v757_v33, %v245_v35 }
 0x138   :  { %v250_v41 = vmul.f32 %v759_v34, %v246_v37  ;;  %v247_v42 = vadd.f32 2.0, %v763_v38 }
 0x139   :  { %v252_v43 = vmul.f32 %v761_v36, %v248_v39  ;;  %v253_v44 = vadd.f32 2.0, %v249_v40  ;;  %v277_v60 = vmul.f32 %v249_v40, %v229_v21 }
 0x13a   :  { %v254_v45 = vadd.f32 2.0, %v250_v41  ;;  %v251_v46 = vmul.f32 %v763_v38, %v247_v42  ;;  %v278_v62 = vmul.f32 %v250_v41, %v230_v22 }
 0x13b   :  { %v256_v47 = vadd.f32 2.0, %v252_v43  ;;  %764 = vrcp.f32 %v253_v44  ;;  %v280_v1 = vmul.f32 %v252_v43, %v925_v23 }
 0x13c   :  { %766 = vrcp.f32 %v254_v45  ;;  %v255_v48 = vadd.f32 2.0, %v251_v46  ;;  %v279_v4 = vmul.f32 %v251_v46, %v927_v24 }
 0x13d   :  { %768 = vrcp.f32 %v256_v47 }
 0x13e   :  { %770 = vrcp.f32 %v255_v48 }
 0x145   :  { %v765_v49 = vpop.eup %764 }
 0x146   :  { %v767_v50 = vpop.eup %766  ;;  %v261_v51 = vmul.f32 %v765_v49, %v253_v44 }
 0x147   :  { %v769_v52 = vpop.eup %768  ;;  %v262_v53 = vmul.f32 %v767_v50, %v254_v45 }
 0x148   :  { %v771_v54 = vpop.eup %770  ;;  %v265_v55 = vsub.f32 2.0, %v261_v51  ;;  %v264_v56 = vmul.f32 %v769_v52, %v256_v47 }
 0x149   :  { %v266_v57 = vsub.f32 2.0, %v262_v53  ;;  %v263_v58 = vmul.f32 %v771_v54, %v255_v48 }
 0x14a   :  { %v269_v59 = vmul.f32 %v765_v49, %v265_v55  ;;  %v268_v61 = vsub.f32 2.0, %v264_v56 }
 0x14b   :  { %v270_v63 = vmul.f32 %v767_v50, %v266_v57  ;;  %v267_v0 = vsub.f32 2.0, %v263_v58 }
 0x14c   :  { %v281_v2 = vmul.f32 %v277_v60, %v269_v59  ;;  %v272_v3 = vmul.f32 %v769_v52, %v268_v61 }
 0x14d   :  { %v282_v6 = vmul.f32 %v278_v62, %v270_v63  ;;  %v271_v7 = vmul.f32 %v771_v54, %v267_v0 }
 0x14e   :  { %v285_v8 = vsel %vm273_vm4, %v229_v21, %v281_v2  ;;  %v284_v9 = vmul.f32 %v280_v1, %v272_v3  ;;  %v823_v21 = vmov 6  }
 0x14f   :  { %v286_v10 = vsel %vm274_vm5, %v230_v22, %v282_v6  ;;  %v283_v11 = vmul.f32 %v279_v4, %v271_v7  ;;  %752 = vset.pattern.permute.xlu1 %v823_v21  ;;  %753 = vset.pattern.permute.xlu0 %v823_v21  ;;  %v295_v22 = vpop.permute.xlu0 %294 }
 0x150   :  { %v711_v12 = vpack.c.bf16 %v286_v10, %v285_v8  ;;  %v288_v13 = vsel %vm276_vm6, %v925_v23, %v284_v9  ;;  %549 = vperm.xlu1 %752, %v860_v5   ;;  %v299_v23 = vpop.permute.xlu1 %298 }
 0x151   :  { %v287_v14 = vsel %vm275_vm7, %v927_v24, %v283_v11 }
 0x152   :  { %712 = vmatprep.subr.bf16.mxu1 %v711_v12  ;;  %v715_v15 = vpack.c.bf16 %v288_v13, %v287_v14 }
 0x153   :  { %714 = vmatpush3.bf16.msra.mxu1 %v711_v12  ;;  %v307_v29 = vpop.permute.xlu0 %306 }
 0x154   :  { %716 = vmatprep.subr.bf16.mxu1 %v715_v15  ;;  %v303_v32 = vpop.permute.xlu1 %302 }
 0x157   :  { %718 = vmatpush3.bf16.msra.mxu1 %v715_v15  ;;  %v455_v9 = vpop.permute.xlu0 %454 }
 0x158   :  { %v451_v1 = vpop.permute.xlu1 %450 }
 0x15a   :  { %689 = vmatmul.mubr.msk.f32.vlgmr.msra.gmra.mrb[0].mxu1 %vm309_vm2, %v290_v16 }
 0x15b   :  { %691 = vmatprep.mubr.msk.f32.mxu1 %vm309_vm2, %v291_v17  ;;  %v459_v11 = vpop.permute.xlu0 %458 }
 0x15c   :  { %v471_v7 = vpop.permute.xlu1 %470 }
 0x15e   :  { %692 = vmatmul.mubr.msk.f32.gmra.mrb[2].mxu1 %vm309_vm2, %v292_v18 }
 0x15f   :  { %v479_v20 = vpop.permute.xlu0 %478 }
 0x160   :  { %v475_v10 = vpop.permute.xlu1 %474 }
 0x164   :  { %v463_v12 = vpop.permute.xlu1 %462 }
 0x168   :  { %v483_v18 = vpop.permute.xlu1 %482 }
 0x22d   :  { %v690_v24 = vpop.f32.mrb[0].mxu1 }
 0x22e   :  { %v394_v25 = vadd.f32 %v690_v24, %v299_v23  ;;  %v388_v26 = vpop.f32.mrb[1].mxu1 }
 0x22f   :  { %v389_v27 = vadd.f32 %v388_v26, %v295_v22 }
 0x230   :  { %v408_v28 = vsel %vm149_vm3, %v394_v25, 0.0 }
 0x231   :  { %v407_v30 = vsel %vm149_vm3, %v389_v27, 0.0  ;;  %v693_v31 = vpop.f32.mrb[2].mxu1 }
 0x232   :  { %v409_v33 = vadd.f32 %v408_v28, %v407_v30  ;;  %v398_v34 = vpop.f32.mrb[3].mxu1  ;;  %v404_v35 = vadd.f32 %v693_v31, %v307_v29 }
 0x233   :  { %v399_v36 = vadd.f32 %v398_v34, %v303_v32 }
 0x234   :  { %v412_v38 = vsel %vm149_vm3, %v404_v35, 0.0 }
 0x235   :  { %v410_v37 = vsel %vm149_vm3, %v399_v36, 0.0 }
 0x236   :  { %v411_v5 = vadd.f32 %v410_v37, %v409_v33 }
 0x238   :  { %v413_v39 = vadd.f32 %v412_v38, %v411_v5 }
 0x23a   :  { %v414_v40 = vrot.slane %v413_v39, 4 }
 0x23c   :  { %v415_v41 = vadd.f32 %v414_v40, %v413_v39 }
 0x23e   :  { %v416_v42 = vrot.slane %v415_v41, 2 }
 0x240   :  { %v417_v43 = vadd.f32 %v416_v42, %v415_v41 }
 0x242   :  { %v418_v44 = vrot.slane %v417_v43, 1 }
 0x244   :  { %v419_v45 = vadd.f32 %v418_v44, %v417_v43 }
 0x246   :  { %v420_v46 = vmul.f32 0.03125, %v419_v45 }
 0x248   :  { %v423_v47 = vsub.f32 %v399_v36, %v420_v46  ;;  %v424_v48 = vsub.f32 %v404_v35, %v420_v46  ;;  %v421_v49 = vsub.f32 %v389_v27, %v420_v46  ;;  %v422_v50 = vsub.f32 %v394_v25, %v420_v46 }
 0x24a   :  { %v427_v51 = vmul.f32 %v423_v47, %v423_v47  ;;  %v425_v52 = vmul.f32 %v421_v49, %v421_v49  ;;  %v426_v53 = vmul.f32 %v422_v50, %v422_v50  ;;  %v428_v54 = vmul.f32 %v424_v48, %v424_v48 }
 0x24c   :  { %v429_v55 = vsel %vm149_vm3, %v425_v52, 0.0  ;;  %v430_v56 = vsel %vm149_vm3, %v426_v53, 0.0  ;;  %v432_v58 = vsel %vm149_vm3, %v427_v51, 0.0  ;;  %v434_v60 = vsel %vm149_vm3, %v428_v54, 0.0 }
 0x24d   :  { %v431_v57 = vadd.f32 %v430_v56, %v429_v55 }
 0x24f   :  { %v433_v59 = vadd.f32 %v432_v58, %v431_v57 }
 0x251   :  { %v435_v61 = vadd.f32 %v434_v60, %v433_v59 }
 0x253   :  { %v436_v62 = vrot.slane %v435_v61, 4 }
 0x255   :  { %v437_v63 = vadd.f32 %v436_v62, %v435_v61 }
 0x257   :  { %v438_v0 = vrot.slane %v437_v63, 2 }
 0x259   :  { %v439_v2 = vadd.f32 %v438_v0, %v437_v63 }
 0x25b   :  { %v440_v3 = vrot.slane %v439_v2, 1 }
 0x25d   :  { %v441_v4 = vadd.f32 %v440_v3, %v439_v2 }
 0x25f   :  { %v442_v6 = vmul.f32 0.03125, %v441_v4 }
 0x261   :  { %v443_v8 = vadd.f32 1e-05, %v442_v6 }
 0x263   :  { %772 = vrsqrt.f32 %v443_v8 }
 0x26d   :  { %v773_v13 = vpop.eup %772 }
 0x26e   :  { %v445_v14 = vmul.f32 %v773_v13, %v421_v49  ;;  %v446_v15 = vmul.f32 %v773_v13, %v422_v50  ;;  %v447_v16 = vmul.f32 %v773_v13, %v423_v47  ;;  %v448_v17 = vmul.f32 %v773_v13, %v424_v48 }
 0x270   :  { %v465_v21 = vmul.f32 %v451_v1, %v445_v14  ;;  %v466_v22 = vmul.f32 %v455_v9, %v446_v15  ;;  %v467_v23 = vmul.f32 %v459_v11, %v447_v16  ;;  %v468_v24 = vmul.f32 %v463_v12, %v448_v17 }
 0x272   :  { %v485_v25 = vadd.f32 %v471_v7, %v465_v21  ;;  %v959_v26 = vadd.f32 %v475_v10, %v466_v22  ;;  %v961_v27 = vadd.f32 %v483_v18, %v468_v24  ;;  %v963_v28 = vadd.f32 %v479_v20, %v467_v23  ;;  %v545_v20 = vld [vmem:[%s996_s1 + $0x40] sm:$0xff]  ;;  %v550_v21 = vpop.permute.xlu1 %549 }
 0x274   :  { %v489_v29 = vmin.f32 %v485_v25, 20.0  ;;  %v490_v30 = vmin.f32 %v959_v26, 20.0  ;;  %v492_v31 = vmin.f32 %v961_v27, 20.0  ;;  %v491_v32 = vmin.f32 %v963_v28, 20.0 }
 0x275   :  { %vm529_vm9 = vcmp.gt.f32.partialorder %v485_v25, 20.0  ;;  %vm530_vm10 = vcmp.gt.f32.partialorder %v959_v26, 20.0  ;;  %vm532_vm11 = vcmp.gt.f32.partialorder %v961_v27, 20.0  ;;  %vm531_vm12 = vcmp.gt.f32.partialorder %v963_v28, 20.0 }
 0x276   :  { %v493_v33 = vmul.f32 1.442695, %v489_v29  ;;  %v495_v34 = vmul.f32 1.442695, %v490_v30  ;;  %v499_v35 = vmul.f32 1.442695, %v492_v31 }
 0x277   :  { %v497_v36 = vmul.f32 1.442695, %v491_v32 }
 0x278   :  { %774 = vpow2.f32 %v493_v33 }
 0x279   :  { %776 = vpow2.f32 %v495_v34 }
 0x27a   :  { %778 = vpow2.f32 %v499_v35 }
 0x27b   :  { %780 = vpow2.f32 %v497_v36 }
 0x282   :  { %v775_v37 = vpop.eup %774 }
 0x283   :  { %v777_v5 = vpop.eup %776  ;;  %v501_v38 = vadd.f32 2.0, %v775_v37 }
 0x284   :  { %v779_v39 = vpop.eup %778  ;;  %v502_v40 = vadd.f32 2.0, %v777_v5 }
 0x285   :  { %v781_v41 = vpop.eup %780  ;;  %v505_v42 = vmul.f32 %v775_v37, %v501_v38  ;;  %v504_v43 = vadd.f32 2.0, %v779_v39 }
 0x286   :  { %v506_v44 = vmul.f32 %v777_v5, %v502_v40  ;;  %v503_v45 = vadd.f32 2.0, %v781_v41 }
 0x287   :  { %v509_v46 = vadd.f32 2.0, %v505_v42  ;;  %v508_v47 = vmul.f32 %v779_v39, %v504_v43  ;;  %v533_v63 = vmul.f32 %v505_v42, %v485_v25 }
 0x288   :  { %v510_v48 = vadd.f32 2.0, %v506_v44  ;;  %v507_v49 = vmul.f32 %v781_v41, %v503_v45  ;;  %v534_v2 = vmul.f32 %v506_v44, %v959_v26 }
 0x289   :  { %782 = vrcp.f32 %v509_v46  ;;  %v512_v50 = vadd.f32 2.0, %v508_v47  ;;  %v536_v7 = vmul.f32 %v508_v47, %v961_v27 }
 0x28a   :  { %784 = vrcp.f32 %v510_v48  ;;  %v511_v51 = vadd.f32 2.0, %v507_v49  ;;  %v535_v10 = vmul.f32 %v507_v49, %v963_v28 }
 0x28b   :  { %786 = vrcp.f32 %v512_v50 }
 0x28c   :  { %788 = vrcp.f32 %v511_v51 }
 0x293   :  { %v783_v52 = vpop.eup %782 }
 0x294   :  { %v785_v53 = vpop.eup %784  ;;  %v517_v54 = vmul.f32 %v783_v52, %v509_v46 }
 0x295   :  { %v787_v55 = vpop.eup %786  ;;  %v518_v56 = vmul.f32 %v785_v53, %v510_v48 }
 0x296   :  { %v789_v57 = vpop.eup %788  ;;  %v521_v58 = vsub.f32 2.0, %v517_v54  ;;  %v520_v59 = vmul.f32 %v787_v55, %v512_v50 }
 0x297   :  { %v522_v60 = vsub.f32 2.0, %v518_v56  ;;  %v519_v61 = vmul.f32 %v789_v57, %v511_v51 }
 0x298   :  { %v525_v62 = vmul.f32 %v783_v52, %v521_v58  ;;  %v524_v0 = vsub.f32 2.0, %v520_v59 }
 0x299   :  { %v526_v1 = vmul.f32 %v785_v53, %v522_v60  ;;  %v523_v3 = vsub.f32 2.0, %v519_v61 }
 0x29a   :  { %v537_v4 = vmul.f32 %v533_v63, %v525_v62  ;;  %v528_v6 = vmul.f32 %v787_v55, %v524_v0 }
 0x29b   :  { %v538_v8 = vmul.f32 %v534_v2, %v526_v1  ;;  %v527_v9 = vmul.f32 %v789_v57, %v523_v3 }
 0x29c   :  { %v540_v11 = vmul.f32 %v536_v7, %v528_v6  ;;  %v541_v12 = vsel %vm529_vm9, %v485_v25, %v537_v4 }
 0x29d   :  { %v539_v13 = vmul.f32 %v535_v10, %v527_v9  ;;  %v542_v14 = vsel %vm530_vm10, %v959_v26, %v538_v8 }
 0x29e   :  { %v720_v15 = vpack.c.bf16 %v542_v14, %v541_v12  ;;  %v544_v16 = vsel %vm532_vm11, %v961_v27, %v540_v11 }
 0x29f   :  { %v543_v17 = vsel %vm531_vm12, %v963_v28, %v539_v13 }
 0x2a0   :  { %721 = vmatpush3.bf16.msra.mxu0 %v720_v15  ;;  %v723_v18 = vpack.c.bf16 %v544_v16, %v543_v17 }
 0x2a1   :  { %722 = vmatprep.subr.bf16.mxu0 %v820_v19 }
 0x2a4   :  { %724 = vmatpush3.bf16.msra.mxu0 %v723_v18 }
 0x2a7   :  { %703 = vmatmul.mubr.msk.f32.vlgmr.msra.gmra.mrb[4].mxu0 %vm309_vm2, %v545_v20 }
 0x37a   :  { %v621_v22 = vpop.f32.mrb[4].mxu0 }
 0x37b   :  { %v622_v23 = vadd.f32 %v621_v22, %v550_v21  ;;  %v704_v24 = vpop.f32.mrb[5].mxu0 }
 0x37d   :  { %625 = vst.msk [vmem:[#allocation2] sm:$0xff] %vm149_vm3, %v622_v23 }
 0x37e   :  { %801 = shalt.err (!%p798_p4)
}
 0x37f   :  { %s802_s17 = scalar_lea.hbm %s998_s3, 128 }
 0x380   :  { %p803_p5 = scmp.ne.s32.totalorder %s998_s3, %s802_s17  ;;  %p806_p6 = scmp.lt.u32.totalorder %s802_s17, %s998_s3 }
 0x382   :  { %p808_p7 = pnand %p806_p6, %p803_p5 }
 0x384   :  { %811 = shalt.err (!%p808_p7)
}
 0x385   :  { %635 = dma.vmem_to_hbm [thread:$0]  %s633_s14, 128, %s998_s3, [#allocation3]  }
 0x386   :  { %812 = dma.done.wait [#allocation3], 128  }
 0x387   :  { %813 = vsyncadd [#allocation3], 4294967168 }
 0x388   :  { %639 = vsyncpa [#allocation3], 1 }

</bundles_post_ra>
